<compile_context>
chip_gen: v7x
topology: tpu7x:2x2x1
jax: 0.10.0
libtpu: 0.0.40
codegen_flags: <defaults>
</compile_context>

<pallas_src>
import jax
import jax.numpy as jnp
from jax.experimental import pallas as pl
from jax.experimental.pallas import tpu as pltpu


_LANE = 128      # lane width
_MAX_TILE = 512  # max row / contraction tile


def _round_up(v, m):
    return ((v + m - 1) // m) * m


def _tile_size(n, max_tile, align):
    """Roughly-equal tiles <= max_tile, aligned to `align`."""
    n_tiles = pl.cdiv(n, max_tile)
    return _round_up(pl.cdiv(n, n_tiles), align)


def _pad2(a, rows, cols, dtype=None):
    a = jnp.asarray(a)
    out = jnp.pad(a, ((0, rows - a.shape[0]), (0, cols - a.shape[1])))
    return out if dtype is None else out.astype(dtype)


def _dgi_mlp_kernel(prelu_ref, adj_ref, xw_ref, w1_ref, b1_ref, w2_ref, b2_ref,
                    out_ref, acc_ref):
    """Fused DGI(GCN) + MLP forward over one (row-tile, contraction-tile) grid step.

    prelu_ref : SMEM [1] f32             -- PReLU negative-slope parameter
    adj_ref   : VMEM [TM, TK] bf16       -- adjacency tile of A_hat (streamed)
    xw_ref    : VMEM [TK, H_pad] bf16    -- contraction tile of X @ W_gcn (streamed)
    w1_ref    : VMEM [H_pad, M_pad] bf16, b1_ref [1, M_pad] f32  -- MLP layer 1 (resident)
    w2_ref    : VMEM [M_pad, O_pad] bf16, b2_ref [1, O_pad] f32  -- MLP layer 2 (resident)
    out_ref   : VMEM [TM, O_pad] bf16    -- written on the last contraction step only
    acc_ref   : VMEM [TM, H_pad] f32     -- GCN accumulator scratch
    """
    k = pl.program_id(1)

    @pl.when(k == 0)
    def _init():
        acc_ref[...] = jnp.zeros_like(acc_ref)

    # Dominant contraction: one MXU pass per step, f32 accumulation.
    acc_ref[...] += jnp.dot(adj_ref[...], xw_ref[...],
                            preferred_element_type=jnp.float32)

    @pl.when(k == pl.num_programs(1) - 1)
    def _epilogue():
        h = acc_ref[...]
        a = prelu_ref[0]
        z = jnp.where(h > 0.0, h, a * h)                 # PReLU (single learned slope)
        h1 = jnp.dot(z.astype(jnp.bfloat16), w1_ref[...],
                     preferred_element_type=jnp.float32) + b1_ref[...]
        h1 = jnp.maximum(h1, 0.0)                        # ReLU
        out = jnp.dot(h1.astype(jnp.bfloat16), w2_ref[...],
                      preferred_element_type=jnp.float32) + b2_ref[...]
        out_ref[...] = out.astype(out_ref.dtype)


def dgi_with_mlp_forward(x, edge_index, params):
    """DGIWithMLP.forward: MLP(GCN_encoder(x, edge_index)).

    Plain-JAX glue builds the gcn_norm-style dense adjacency (scatter has no clean
    Pallas TPU equivalent) and the tiny X @ W_gcn product; the N^2 aggregation and the
    whole MLP run inside one gridded Pallas kernel.
    """
    n, _ = x.shape
    w_gcn = params["w_gcn"]
    w1, b1 = params["w1"], params["b1"]
    w2, b2 = params["w2"], params["b2"]
    prelu = params["prelu"]

    hidden = w_gcn.shape[1]
    mlp_hidden = w1.shape[1]
    out_dim = w2.shape[1]

    # --- tiling (bf16 row tiles -> 16-sublane aligned, contraction -> 128-lane aligned)
    tm = _tile_size(n, _MAX_TILE, 16)
    tk = _tile_size(n, _MAX_TILE, _LANE)
    n_pad_m = _round_up(n, tm)          # output / adjacency-row padding
    n_pad_k = _round_up(n, tk)          # contraction / adjacency-column padding
    h_pad = _round_up(hidden, _LANE)
    m_pad = _round_up(mlp_hidden, _LANE)
    o_pad = _round_up(out_dim, _LANE)

    # --- gcn_norm-style adjacency (PyG GCNConv semantics), built once at padded size:
    #     A[target, source] += 1 per edge (duplicates accumulate),
    #     add_remaining_self_loops (self loop only if node has none),
    #     A_hat = D^{-1/2} A D^{-1/2}, D = in-degree incl. self loops.
    src = edge_index[0].astype(jnp.int32)
    dst = edge_index[1].astype(jnp.int32)
    ones = jnp.ones(src.shape, jnp.float32)
    deg = jnp.zeros((n,), jnp.float32).at[dst].add(ones)
    self_cnt = jnp.zeros((n,), jnp.float32).at[dst].add(
        jnp.where(src == dst, 1.0, 0.0))
    add_self = jnp.where(self_cnt > 0.0, 0.0, 1.0)      # only where no self loop yet
    deg = deg + add_self
    d_inv_sqrt = jnp.where(deg > 0.0, jax.lax.rsqrt(deg), 0.0)

    idx = jnp.arange(n, dtype=jnp.int32)
    edge_w = d_inv_sqrt[dst] * d_inv_sqrt[src]          # normalization folded per-edge
    adj_p = (jnp.zeros((n_pad_m, n_pad_k), jnp.float32)
             .at[dst, src].add(edge_w)
             .at[idx, idx].add(add_self * d_inv_sqrt * d_inv_sqrt)
             ).astype(jnp.bfloat16)

    # --- pre-compute XW = X @ W_gcn once (tiny N*F*H matmul), pad, cast to bf16.
    xw = jnp.dot(x.astype(jnp.float32), w_gcn.astype(jnp.float32))
    xw_p = _pad2(xw, n_pad_k, h_pad, jnp.bfloat16)

    w1_p = _pad2(w1, h_pad, m_pad, jnp.bfloat16)
    w2_p = _pad2(w2, m_pad, o_pad, jnp.bfloat16)
    b1_p = _pad2(b1.reshape(1, -1), 1, m_pad, jnp.float32)
    b2_p = _pad2(b2.reshape(1, -1), 1, o_pad, jnp.float32)
    prelu_s = prelu.reshape((1,)).astype(jnp.float32)

    grid = (n_pad_m // tm, n_pad_k // tk)

    # Advisory cost for XLA's scheduler around the custom call.
    flops = (2 * n_pad_m * n_pad_k * h_pad
             + 2 * n_pad_m * h_pad * m_pad
             + 2 * n_pad_m * m_pad * o_pad)
    n_row_tiles = n_pad_m // tm
    bytes_accessed = (adj_p.size * 2 + xw_p.size * 2 * n_row_tiles
                      + (w1_p.size + w2_p.size) * 2
                      + (b1_p.size + b2_p.size) * 4
                      + n_pad_m * o_pad * 2 + 4)

    # Per-step VMEM is N-independent: double-buffered streamed tiles + resident MLP
    # weights + accumulator + epilogue headroom.  Leave >=15% of physical VMEM free.
    try:
        vmem_cap = int(getattr(pltpu.get_tpu_info(), "vmem_capacity_bytes",
                               64 * 1024 * 1024))
    except Exception:  # pragma: no cover - conservative fallback
        vmem_cap = 64 * 1024 * 1024
    vmem_need = (2 * tm * tk * 2                      # adjacency tile (x2 buffers)
                 + 2 * tk * h_pad * 2                 # XW tile (x2 buffers)
                 + 2 * tm * o_pad * 2                 # output tile (x2 buffers)
                 + 2 * (h_pad * m_pad + m_pad * o_pad) * 2
                 + 2 * (m_pad + o_pad) * 4
                 + tm * h_pad * 4                     # f32 accumulator scratch
                 + 4 * tm * max(h_pad, m_pad, o_pad) * 4)   # epilogue temps headroom
    vmem_limit = min(int(0.85 * vmem_cap),
                     max(4 * vmem_need, 32 * 1024 * 1024))
    vmem_limit = max(vmem_limit, 2 * vmem_need)

    out_p = pl.pallas_call(
        _dgi_mlp_kernel,
        out_shape=jax.ShapeDtypeStruct((n_pad_m, o_pad), jnp.bfloat16),
        grid=grid,
        in_specs=[
            pl.BlockSpec(memory_space=pltpu.MemorySpace.SMEM),    # prelu scalar
            pl.BlockSpec((tm, tk), lambda i, k: (i, k)),          # adjacency tile
            pl.BlockSpec((tk, h_pad), lambda i, k: (k, 0)),       # XW contraction tile
            pl.BlockSpec((h_pad, m_pad), lambda i, k: (0, 0)),    # w1 (resident)
            pl.BlockSpec((1, m_pad), lambda i, k: (0, 0)),        # b1 (resident)
            pl.BlockSpec((m_pad, o_pad), lambda i, k: (0, 0)),    # w2 (resident)
            pl.BlockSpec((1, o_pad), lambda i, k: (0, 0)),        # b2 (resident)
        ],
        out_specs=pl.BlockSpec((tm, o_pad), lambda i, k: (i, 0)),
        scratch_shapes=[pltpu.VMEM((tm, h_pad), jnp.float32)],
        compiler_params=pltpu.CompilerParams(
            dimension_semantics=("parallel", "arbitrary"),
            vmem_limit_bytes=int(vmem_limit),
        ),
        cost_estimate=pl.CostEstimate(
            flops=int(flops), transcendentals=0,
            bytes_accessed=int(bytes_accessed)),
    )(prelu_s, adj_p, xw_p, w1_p, b1_p, w2_p, b2_p)

    return out_p[:n, :out_dim].astype(jnp.float32)


def init_params(key, f_in, hidden, mlp_hidden, out_dim):
    k0, k1, k2 = jax.random.split(key, 3)
    scale = lambda fan_in: 1.0 / jnp.sqrt(jnp.float32(fan_in))
    return {
        "w_gcn": jax.random.normal(k0, (f_in, hidden), jnp.float32) * scale(f_in),
        "prelu": jnp.full((1,), 0.25, jnp.float32),   # nn.PReLU default init
        "w1": jax.random.normal(k1, (hidden, mlp_hidden), jnp.float32) * scale(hidden),
        "b1": jnp.zeros((mlp_hidden,), jnp.float32),
        "w2": jax.random.normal(k2, (mlp_hidden, out_dim), jnp.float32) * scale(mlp_hidden),
        "b2": jnp.zeros((out_dim,), jnp.float32),
    }


def _reference(x, edge_index, params):
    """Pure-JAX f32 reference of the same forward (for a sanity check)."""
    n = x.shape[0]
    src, dst = edge_index[0], edge_index[1]
    adj = jnp.zeros((n, n), jnp.float32).at[dst, src].add(1.0)
    diag = jnp.diagonal(adj)
    adj = adj + jnp.diag(jnp.where(diag > 0.0, 0.0, 1.0))   # add_remaining_self_loops
    deg = jnp.sum(adj, axis=1)
    dinv = jnp.where(deg > 0.0, jax.lax.rsqrt(deg), 0.0)
    adj_hat = adj * dinv[:, None] * dinv[None, :]
    h = adj_hat @ (x @ params["w_gcn"])
    a = params["prelu"][0]
    z = jnp.where(h > 0.0, h, a * h)
    h1 = jnp.maximum(z @ params["w1"] + params["b1"], 0.0)
    return h1 @ params["w2"] + params["b2"]


if __name__ == "__main__":
    key = jax.random.PRNGKey(0)
    k_x, k_e, k_p = jax.random.split(key, 3)

    # Small graph: 256 nodes, 16-dim topological features, 512 random (directed) edges.
    N, F_IN, HIDDEN, MLP_HIDDEN, OUT = 256, 16, 64, 32, 8
    x = jax.random.normal(k_x, (N, F_IN), jnp.float32)
    edge_index = jax.random.randint(k_e, (2, 512), 0, N, dtype=jnp.int32)

    params = init_params(k_p, F_IN, HIDDEN, MLP_HIDDEN, OUT)

    out = dgi_with_mlp_forward(x, edge_index, params)
    out = jax.block_until_ready(out)
    assert out.shape == (N, OUT)

    # Loose sanity check vs. f32 reference (kernel runs the matmuls in bf16).
    ref = _reference(x, edge_index, params)
    err = float(jnp.max(jnp.abs(out - ref)) / (jnp.max(jnp.abs(ref)) + 1e-6))
    assert err < 0.1, f"max-normalized error too large: {err}"

    print("KERNEL_OK")
</pallas_src>

<mosaic_0001>
module attributes {stable_mosaic.version = 11 : i64} {
  func.func @_dgi_mlp_kernel(%arg0: i32, %arg1: i32, %arg2: memref<1xf32, #tpu.memory_space<smem>>, %arg3: memref<256x256xbf16, #tpu.memory_space<vmem>>, %arg4: memref<256x128xbf16, #tpu.memory_space<vmem>>, %arg5: memref<128x128xbf16, #tpu.memory_space<vmem>>, %arg6: memref<1x128xf32, #tpu.memory_space<vmem>>, %arg7: memref<128x128xbf16, #tpu.memory_space<vmem>>, %arg8: memref<1x128xf32, #tpu.memory_space<vmem>>, %arg9: memref<256x128xbf16, #tpu.memory_space<vmem>>, %arg10: memref<256x128xf32, #tpu.memory_space<vmem>>) attributes {dimension_semantics = [#tpu.dimension_semantics<parallel>, #tpu.dimension_semantics<arbitrary>], iteration_bounds = array<i64: 1, 1>, scalar_prefetch = 0 : i64, scratch_operands = 1 : i64, tpu.core_type = #tpu.core_type<tc>, window_params = [{transform_indices = @transform_0, window_bounds = array<i64: 1>}, {transform_indices = @transform_1, window_bounds = array<i64: 256, 256>}, {transform_indices = @transform_2, window_bounds = array<i64: 256, 128>}, {pipeline_mode = #tpu.pipeline_mode<synchronous>, transform_indices = @transform_3, window_bounds = array<i64: 128, 128>}, {pipeline_mode = #tpu.pipeline_mode<synchronous>, transform_indices = @transform_4, window_bounds = array<i64: 1, 128>}, {pipeline_mode = #tpu.pipeline_mode<synchronous>, transform_indices = @transform_5, window_bounds = array<i64: 128, 128>}, {pipeline_mode = #tpu.pipeline_mode<synchronous>, transform_indices = @transform_6, window_bounds = array<i64: 1, 128>}, {transform_indices = @transform_7, window_bounds = array<i64: 256, 128>}]} {
    %c0_i32 = arith.constant 0 : i32
    %0 = arith.cmpi eq, %arg1, %c0_i32 : i32
    %1 = arith.extui %0 : i1 to i32
    %c0_i32_0 = arith.constant 0 : i32
    %2 = arith.cmpi ne, %1, %c0_i32_0 : i32
    scf.if %2 {
      %cst_10 = arith.constant 0.000000e+00 : f32
      %12 = vector.broadcast %cst_10 : f32 to vector<256x128xf32>
      %c0_11 = arith.constant 0 : index
      %c0_12 = arith.constant 0 : index
      %13 = vector.load %arg10[%c0_11, %c0_12] : memref<256x128xf32, #tpu.memory_space<vmem>>, vector<256x128xf32>
      tpu.vector_store %arg10[%c0_11, %c0_12], %12 {strides = array<i32>} : memref<256x128xf32, #tpu.memory_space<vmem>>, vector<256x128xf32>,
    } else {
    }
    %c0 = arith.constant 0 : index
    %c0_1 = arith.constant 0 : index
    %3 = vector.load %arg10[%c0, %c0_1] : memref<256x128xf32, #tpu.memory_space<vmem>>, vector<256x128xf32>
    %c0_2 = arith.constant 0 : index
    %c0_3 = arith.constant 0 : index
    %4 = vector.load %arg3[%c0_2, %c0_3] : memref<256x256xbf16, #tpu.memory_space<vmem>>, vector<256x256xbf16>
    %c0_4 = arith.constant 0 : index
    %c0_5 = arith.constant 0 : index
    %5 = vector.load %arg4[%c0_4, %c0_5] : memref<256x128xbf16, #tpu.memory_space<vmem>>, vector<256x128xbf16>
    %cst = arith.constant dense<0.000000e+00> : vector<256x128xf32>
    %6 = tpu.matmul %4, %5, %cst {dimension_numbers = #tpu.dot_dimension_numbers<[1], [0], [0], [1], [0, 0, 1, 1], [], []>} : vector<256x256xbf16>, vector<256x128xbf16>, vector<256x128xf32> -> vector<256x128xf32>
    %7 = arith.addf %3, %6 : vector<256x128xf32>
    %c0_6 = arith.constant 0 : index
    %c0_7 = arith.constant 0 : index
    %8 = vector.load %arg10[%c0_6, %c0_7] : memref<256x128xf32, #tpu.memory_space<vmem>>, vector<256x128xf32>
    tpu.vector_store %arg10[%c0_6, %c0_7], %7 {strides = array<i32>} : memref<256x128xf32, #tpu.memory_space<vmem>>, vector<256x128xf32>,
    %c0_i32_8 = arith.constant 0 : i32
    %9 = arith.cmpi eq, %arg1, %c0_i32_8 : i32
    %10 = arith.extui %9 : i1 to i32
    %c0_i32_9 = arith.constant 0 : i32
    %11 = arith.cmpi ne, %10, %c0_i32_9 : i32
    scf.if %11 {
      %c0_10 = arith.constant 0 : index
      %c0_11 = arith.constant 0 : index
      %12 = vector.load %arg10[%c0_10, %c0_11] : memref<256x128xf32, #tpu.memory_space<vmem>>, vector<256x128xf32>
      %c0_12 = arith.constant 0 : index
      %13 = memref.load %arg2[%c0_12] : memref<1xf32, #tpu.memory_space<smem>>
      %cst_13 = arith.constant 0.000000e+00 : f32
      %14 = vector.broadcast %cst_13 : f32 to vector<256x128xf32>
      %15 = arith.cmpf ogt, %12, %14 : vector<256x128xf32>
      %16 = vector.broadcast %13 : f32 to vector<256x128xf32>
      %17 = arith.mulf %16, %12 : vector<256x128xf32>
      %18 = arith.select %15, %12, %17 : vector<256x128xi1>, vector<256x128xf32>
      %19 = arith.truncf %18 : vector<256x128xf32> to vector<256x128xbf16>
      %c0_14 = arith.constant 0 : index
      %c0_15 = arith.constant 0 : index
      %20 = vector.load %arg5[%c0_14, %c0_15] : memref<128x128xbf16, #tpu.memory_space<vmem>>, vector<128x128xbf16>
      %cst_16 = arith.constant dense<0.000000e+00> : vector<256x128xf32>
      %21 = tpu.matmul %19, %20, %cst_16 {dimension_numbers = #tpu.dot_dimension_numbers<[1], [0], [0], [1], [0, 0, 1, 1], [], []>} : vector<256x128xbf16>, vector<128x128xbf16>, vector<256x128xf32> -> vector<256x128xf32>
      %c0_17 = arith.constant 0 : index
      %c0_18 = arith.constant 0 : index
      %22 = vector.load %arg6[%c0_17, %c0_18] : memref<1x128xf32, #tpu.memory_space<vmem>>, vector<1x128xf32>
      %23 = vector.broadcast %22 : vector<1x128xf32> to vector<256x128xf32>
      %24 = arith.addf %21, %23 : vector<256x128xf32>
      %cst_19 = arith.constant 0.000000e+00 : f32
      %25 = vector.broadcast %cst_19 : f32 to vector<256x128xf32>
      %26 = arith.maximumf %24, %25 : vector<256x128xf32>
      %27 = arith.truncf %26 : vector<256x128xf32> to vector<256x128xbf16>
      %c0_20 = arith.constant 0 : index
      %c0_21 = arith.constant 0 : index
      %28 = vector.load %arg7[%c0_20, %c0_21] : memref<128x128xbf16, #tpu.memory_space<vmem>>, vector<128x128xbf16>
      %cst_22 = arith.constant dense<0.000000e+00> : vector<256x128xf32>
      %29 = tpu.matmul %27, %28, %cst_22 {dimension_numbers = #tpu.dot_dimension_numbers<[1], [0], [0], [1], [0, 0, 1, 1], [], []>} : vector<256x128xbf16>, vector<128x128xbf16>, vector<256x128xf32> -> vector<256x128xf32>
      %c0_23 = arith.constant 0 : index
      %c0_24 = arith.constant 0 : index
      %30 = vector.load %arg8[%c0_23, %c0_24] : memref<1x128xf32, #tpu.memory_space<vmem>>, vector<1x128xf32>
      %31 = vector.broadcast %30 : vector<1x128xf32> to vector<256x128xf32>
      %32 = arith.addf %29, %31 : vector<256x128xf32>
      %33 = arith.truncf %32 : vector<256x128xf32> to vector<256x128xbf16>
      %c0_25 = arith.constant 0 : index
      %c0_26 = arith.constant 0 : index
      %34 = vector.load %arg9[%c0_25, %c0_26] : memref<256x128xbf16, #tpu.memory_space<vmem>>, vector<256x128xbf16>
      tpu.vector_store %arg9[%c0_25, %c0_26], %33 {strides = array<i32>} : memref<256x128xbf16, #tpu.memory_space<vmem>>, vector<256x128xbf16>,
    } else {
    }
    return
  }
  func.func @transform_0(%arg0: i32, %arg1: i32) -> i32 {
    %c0_i32 = arith.constant 0 : i32
    %c0_i32_0 = arith.constant 0 : i32
    return %c0_i32 : i32
  }
  func.func @transform_1(%arg0: i32, %arg1: i32) -> (i32, i32) {
    %c0_i32 = arith.constant 0 : i32
    return %arg0, %arg1 : i32, i32
  }
  func.func @transform_2(%arg0: i32, %arg1: i32) -> (i32, i32) {
    %c0_i32 = arith.constant 0 : i32
    %c0_i32_0 = arith.constant 0 : i32
    return %arg1, %c0_i32 : i32, i32
  }
  func.func @transform_3(%arg0: i32, %arg1: i32) -> (i32, i32) {
    %c0_i32 = arith.constant 0 : i32
    %c0_i32_0 = arith.constant 0 : i32
    %c0_i32_1 = arith.constant 0 : i32
    return %c0_i32, %c0_i32_0 : i32, i32
  }
  func.func @transform_4(%arg0: i32, %arg1: i32) -> (i32, i32) {
    %c0_i32 = arith.constant 0 : i32
    %c0_i32_0 = arith.constant 0 : i32
    %c0_i32_1 = arith.constant 0 : i32
    return %c0_i32, %c0_i32_0 : i32, i32
  }
  func.func @transform_5(%arg0: i32, %arg1: i32) -> (i32, i32) {
    %c0_i32 = arith.constant 0 : i32
    %c0_i32_0 = arith.constant 0 : i32
    %c0_i32_1 = arith.constant 0 : i32
    return %c0_i32, %c0_i32_0 : i32, i32
  }
  func.func @transform_6(%arg0: i32, %arg1: i32) -> (i32, i32) {
    %c0_i32 = arith.constant 0 : i32
    %c0_i32_0 = arith.constant 0 : i32
    %c0_i32_1 = arith.constant 0 : i32
    return %c0_i32, %c0_i32_0 : i32, i32
  }
  func.func @transform_7(%arg0: i32, %arg1: i32) -> (i32, i32) {
    %c0_i32 = arith.constant 0 : i32
    %c0_i32_0 = arith.constant 0 : i32
    return %arg0, %c0_i32 : i32, i32
  }
}

</mosaic_0001>

<bundles_post_ra>
// kernel: tpu_custom_call.1
= control target key start
LH: loop header
LB: loop body
LE: loop exit
PB: predicated region body
PF: predicated region fallthrough
CT: control target
= control target key end

     0   :  { %13 = vsyncpa [#allocation5], 0  ;;  %s2464_s0 = inlined_call_operand.<no memory space> [shape: f32[1], index: 0, kind: input, shape index: {}]   ;;  %s2465_s1 = inlined_call_operand.hbm [shape: bf16[256,256], index: 1, kind: input, shape index: {}]   ;;  %s2466_s2 = inlined_call_operand.hbm [shape: bf16[256,128], index: 2, kind: input, shape index: {}]   ;;  %s2467_s3 = inlined_call_operand.hbm [shape: bf16[128,128], index: 3, kind: input, shape index: {}]   ;;  %s2468_s4 = inlined_call_operand.vmem [shape: f32[1,128], index: 4, kind: input, shape index: {}]   ;;  %s2469_s5 = inlined_call_operand.hbm [shape: bf16[128,128], index: 5, kind: input, shape index: {}]   ;;  %s2470_s6 = inlined_call_operand.vmem [shape: f32[1,128], index: 6, kind: input, shape index: {}]   ;;  %s2471_s7 = inlined_call_operand.hbm [shape: bf16[256,128], index: 7, kind: output, shape index: {}]  }
   0x1   :  { %14 = vsyncpa [#allocation8], 0 }
   0x2   :  { %15 = vsyncpa [#allocation11], 0 }
   0x3   :  { %16 = vsyncpa [#allocation6], 0  ;;  %s2225_s24 = smov [#allocation7]   ;;  %s2107_s28 = scalar_lea.hbm %s2466_s2, 2048 }
   0x4   :  { %s36_s25 = sshll.u32 %s2225_s24, 4  ;;  %p2108_p0 = scmp.ne.s32.totalorder %s2466_s2, %s2107_s28  ;;  %s37_s25 = int_to_ptr.vmem [resolvable:$true] %s36_s25 }
   0x5   :  { %p2111_p1 = scmp.lt.u32.totalorder %s2107_s28, %s2466_s2 }
   0x7   :  { %p2113_p2 = pnand %p2111_p1, %p2108_p0 }
   0x9   :  { %2116 = shalt.err (!%p2113_p2)
}
   0xa   :  { %s2117_s10 = scalar_lea.vmem %s37_s25, 2048  ;;  %p2122_p4 = scmp.lt.s32.totalorder %s37_s25, %s37_s25 }
   0xb   :  { %p2118_p3 = scmp.ne.s32.totalorder %s37_s25, %s2117_s10  ;;  %p2123_p5 = scmp.lt.s32.totalorder %s2117_s10, %s2117_s10 }
   0xd   :  { %p2124_p6 = por %p2123_p5, %p2122_p4 }
   0xf   :  { %p2125_p7 = pnand %p2124_p6, %p2118_p3 }
  0x11   :  { %2128 = shalt.err (!%p2125_p7)
}
  0x12   :  { %s2226_s11 = smov 64   ;;  %s2227_s12 = smov 4  }
  0x13   :  { %42 = dma.hbm_to_vmem [thread:$0]  %s2466_s2, 2048, %s37_s25, [#allocation8], %s2226_s11, %s2226_s11, %s2227_s12  }
  0x14   :  { %s2228_s15 = smov [#allocation4]   ;;  %s2129_s19 = scalar_lea.hbm %s2465_s1, 4096 }
  0x15   :  { %s24_s16 = sshll.u32 %s2228_s15, 4  ;;  %p2130_p8 = scmp.ne.s32.totalorder %s2465_s1, %s2129_s19  ;;  %s25_s16 = int_to_ptr.vmem [resolvable:$true] %s24_s16 }
  0x16   :  { %p2133_p9 = scmp.lt.u32.totalorder %s2129_s19, %s2465_s1 }
  0x18   :  { %p2135_p10 = pnand %p2133_p9, %p2130_p8 }
  0x1a   :  { %2138 = shalt.err (!%p2135_p10)
}
  0x1b   :  { %s2139_s24 = scalar_lea.vmem %s25_s16, 4096  ;;  %p2144_p12 = scmp.lt.s32.totalorder %s25_s16, %s25_s16 }
  0x1c   :  { %p2140_p11 = scmp.ne.s32.totalorder %s25_s16, %s2139_s24  ;;  %p2145_p13 = scmp.lt.s32.totalorder %s2139_s24, %s2139_s24 }
  0x1e   :  { %p2146_p0 = por %p2145_p13, %p2144_p12 }
  0x20   :  { %p2147_p1 = pnand %p2146_p0, %p2140_p11 }
  0x22   :  { %2150 = shalt.err (!%p2147_p1)
}
  0x23   :  { %s2229_s2 = smov 128   ;;  %s2230_s25 = smov 8  }
  0x24   :  { %30 = dma.hbm_to_vmem [thread:$0]  %s2465_s1, 4096, %s25_s16, [#allocation5], %s2229_s2, %s2229_s2, %s2230_s25  }
  0x25   :  { %s2231_s28 = smov [#allocation9]   ;;  %s2232_s30 = smov [#allocation10]  }
  0x26   :  { %s48_s29 = sshll.u32 %s2231_s28, 4  ;;  %s62_s8 = sshll.u32 %s2232_s30, 4  ;;  %s49_s29 = int_to_ptr.vmem [resolvable:$true] %s48_s29  ;;  %s2301_s8 = int_to_ptr.vmem [resolvable:$true] %s62_s8 }
  0x27   :  { %s2151_s13 = scalar_lea.hbm %s2467_s3, 1024 }
  0x28   :  { %p2152_p2 = scmp.ne.s32.totalorder %s2467_s3, %s2151_s13  ;;  %p2155_p3 = scmp.lt.u32.totalorder %s2151_s13, %s2467_s3 }
  0x2a   :  { %p2157_p4 = pnand %p2155_p3, %p2152_p2 }
  0x2c   :  { %2160 = shalt.err (!%p2157_p4)
}
  0x2d   :  { %s2161_s1 = scalar_lea.vmem %s49_s29, 1024  ;;  %p2166_p6 = scmp.lt.s32.totalorder %s49_s29, %s49_s29 }
  0x2e   :  { %p2162_p5 = scmp.ne.s32.totalorder %s49_s29, %s2161_s1  ;;  %p2167_p7 = scmp.lt.s32.totalorder %s2161_s1, %s2161_s1 }
  0x30   :  { %p2168_p8 = por %p2167_p7, %p2166_p6 }
  0x32   :  { %p2169_p9 = pnand %p2168_p8, %p2162_p5 }
  0x34   :  { %2172 = shalt.err (!%p2169_p9)
}
  0x35   :  { %54 = dma.hbm_to_vmem [thread:$0]  %s2467_s3, 1024, %s49_s29, [#allocation8], %s2226_s11, %s2226_s11, %s2227_s12  }
  0x36   :  { %s2173_s22 = scalar_lea.hbm %s2469_s5, 1024 }
  0x37   :  { %p2174_p10 = scmp.ne.s32.totalorder %s2469_s5, %s2173_s22  ;;  %p2177_p11 = scmp.lt.u32.totalorder %s2173_s22, %s2469_s5 }
  0x39   :  { %p2179_p12 = pnand %p2177_p11, %p2174_p10 }
  0x3b   :  { %2182 = shalt.err (!%p2179_p12)
}
  0x3c   :  { %s2183_s26 = scalar_lea.vmem %s2301_s8, 1024  ;;  %p2188_p0 = scmp.lt.s32.totalorder %s2301_s8, %s2301_s8 }
  0x3d   :  { %p2184_p13 = scmp.ne.s32.totalorder %s2301_s8, %s2183_s26  ;;  %p2189_p1 = scmp.lt.s32.totalorder %s2183_s26, %s2183_s26 }
  0x3f   :  { %p2190_p2 = por %p2189_p1, %p2188_p0 }
  0x41   :  { %p2191_p3 = pnand %p2190_p2, %p2184_p13 }
  0x43   :  { %2194 = shalt.err (!%p2191_p3)
}
  0x44   :  { %68 = dma.hbm_to_vmem [thread:$0]  %s2469_s5, 1024, %s2301_s8, [#allocation11], %s2226_s11, %s2226_s11, %s2227_s12  }
  0x45   :  { %2217 = dma.done.wait [#allocation5], 4096  }
  0x46   :  { %2218 = vsyncadd [#allocation5], 4294963200 }
  0x47   :  { %2219 = dma.done.wait [#allocation8], 3072  }
  0x48   :  { %2220 = vsyncadd [#allocation8], 4294964224 }
  0x49   :  { %2221 = dma.done.wait [#allocation11], 1024  }
  0x4a   :  { %2222 = vsyncadd [#allocation11], 4294966272  ;;  %v2027_v0 = vld [vmem:[#allocation7 + $0x40] sm:$0xff]   ;;  %v2029_v2 = vld [vmem:[#allocation7 + $0x48] sm:$0xff]   ;;  %v2341_v58 = vstv %s2464_s0 }
  0x4b   :  { %v2028_v1 = vld [vmem:[#allocation7] sm:$0xff]   ;;  %1762 = vmatprep.subr.bf16.mxu0 %v2027_v0  ;;  %v2030_v3 = vld [vmem:[#allocation7 + $0x8] sm:$0xff]   ;;  %v2031_v4 = vld [vmem:[#allocation7 + $0x50] sm:$0xff]  }
  0x4c   :  { %1763 = vmatpush3.bf16.msra.mxu0 %v2028_v1  ;;  %v2032_v5 = vld [vmem:[#allocation7 + $0x10] sm:$0xff]   ;;  %v2033_v6 = vld [vmem:[#allocation7 + $0x58] sm:$0xff]   ;;  %v2035_v8 = vld [vmem:[#allocation7 + $0x60] sm:$0xff]  }
  0x4d   :  { %1764 = vmatprep.subr.bf16.mxu0 %v2029_v2  ;;  %v2034_v7 = vld [vmem:[#allocation7 + $0x18] sm:$0xff]   ;;  %v2036_v9 = vld [vmem:[#allocation7 + $0x20] sm:$0xff]   ;;  %v2037_v10 = vld [vmem:[#allocation7 + $0x68] sm:$0xff]  }
  0x4e   :  { %v2045_v11 = vld [vmem:[#allocation4 + $0x4] ss:$8 sps:$4 sm:$0xff]   ;;  %v2039_v13 = vld [vmem:[#allocation7 + $0x70] sm:$0xff]   ;;  %v2041_v15 = vld [vmem:[#allocation7 + $0x78] sm:$0xff]  }
  0x4f   :  { %v2038_v12 = vld [vmem:[#allocation7 + $0x28] sm:$0xff]   ;;  %504 = vmatprep.mubr.bf16.mxu0 %v2045_v11  ;;  %v2040_v14 = vld [vmem:[#allocation7 + $0x30] sm:$0xff]   ;;  %v2042_v16 = vld [vmem:[#allocation7 + $0x38] sm:$0xff]  }
  0x50   :  { %1765 = vmatpush3.bf16.msra.mxu0 %v2030_v3  ;;  %v2043_v17 = vld [vmem:[#allocation4] ss:$8 sps:$4 sm:$0xff]   ;;  %v2046_v18 = vld [vmem:[#allocation4 + $0x14] ss:$8 sps:$4 sm:$0xff]   ;;  %v2048_v19 = vld [vmem:[#allocation4 + $0x10] ss:$8 sps:$4 sm:$0xff]  }
  0x51   :  { %1766 = vmatprep.subr.bf16.mxu0 %v2031_v4  ;;  %v2049_v20 = vld [vmem:[#allocation4 + $0x24] ss:$8 sps:$4 sm:$0xff]   ;;  %v2093_v23 = vld [vmem:[#allocation9 + $0x10] sm:$0xff]   ;;  %v2051_v24 = vld [vmem:[#allocation4 + $0x20] ss:$8 sps:$4 sm:$0xff]  }
  0x52   :  { %v2091_v21 = vld [vmem:[#allocation9] sm:$0xff]   ;;  %v2092_v22 = vld [vmem:[#allocation9 + $0x8] sm:$0xff]   ;;  %v2094_v25 = vld [vmem:[#allocation9 + $0x18] sm:$0xff]  }
  0x53   :  { %1922 = vmatprep.subr.bf16.mxu1 %v2091_v21  ;;  %v2052_v26 = vld [vmem:[#allocation4 + $0x34] ss:$8 sps:$4 sm:$0xff]   ;;  %v2054_v27 = vld [vmem:[#allocation4 + $0x30] ss:$8 sps:$4 sm:$0xff]   ;;  %v2055_v28 = vld [vmem:[#allocation4 + $0x44] ss:$8 sps:$4 sm:$0xff]  }
  0x54   :  { %1767 = vmatpush3.bf16.msra.mxu0 %v2032_v5  ;;  %1923 = vmatpush3.bf16.msra.mxu1 %v2091_v21  ;;  %v2057_v29 = vld [vmem:[#allocation4 + $0x40] ss:$8 sps:$4 sm:$0xff]   ;;  %v2058_v30 = vld [vmem:[#allocation4 + $0x54] ss:$8 sps:$4 sm:$0xff]   ;;  %v2060_v31 = vld [vmem:[#allocation4 + $0x50] ss:$8 sps:$4 sm:$0xff]  }
  0x55   :  { %1768 = vmatprep.subr.bf16.mxu0 %v2033_v6  ;;  %1924 = vmatprep.subr.bf16.mxu1 %v2092_v22  ;;  %v2061_v32 = vld [vmem:[#allocation4 + $0x64] ss:$8 sps:$4 sm:$0xff]   ;;  %v2063_v33 = vld [vmem:[#allocation4 + $0x60] ss:$8 sps:$4 sm:$0xff]   ;;  %v2064_v34 = vld [vmem:[#allocation4 + $0x74] ss:$8 sps:$4 sm:$0xff]  }
  0x56   :  { %v2066_v35 = vld [vmem:[#allocation4 + $0x70] ss:$8 sps:$4 sm:$0xff]   ;;  %v2067_v36 = vld [vmem:[#allocation4 + $0x84] ss:$8 sps:$4 sm:$0xff]   ;;  %v2069_v37 = vld [vmem:[#allocation4 + $0x80] ss:$8 sps:$4 sm:$0xff]  }
  0x57   :  { %v2070_v38 = vld [vmem:[#allocation4 + $0x94] ss:$8 sps:$4 sm:$0xff]   ;;  %v2072_v39 = vld [vmem:[#allocation4 + $0x90] ss:$8 sps:$4 sm:$0xff]   ;;  %v2073_v40 = vld [vmem:[#allocation4 + $0xa4] ss:$8 sps:$4 sm:$0xff]  }
  0x58   :  { %1769 = vmatpush3.bf16.msra.mxu0 %v2034_v7  ;;  %1925 = vmatpush3.bf16.msra.mxu1 %v2092_v22  ;;  %v2075_v41 = vld [vmem:[#allocation4 + $0xa0] ss:$8 sps:$4 sm:$0xff]   ;;  %v2076_v42 = vld [vmem:[#allocation4 + $0xb4] ss:$8 sps:$4 sm:$0xff]   ;;  %v2078_v43 = vld [vmem:[#allocation4 + $0xb0] ss:$8 sps:$4 sm:$0xff]  }
  0x59   :  { %1770 = vmatprep.subr.bf16.mxu0 %v2035_v8  ;;  %1926 = vmatprep.subr.bf16.mxu1 %v2093_v23  ;;  %v2095_v44 = vld [vmem:[#allocation9 + $0x20] sm:$0xff]   ;;  %v2096_v46 = vld [vmem:[#allocation9 + $0x28] sm:$0xff]   ;;  %v2097_v48 = vld [vmem:[#allocation9 + $0x30] sm:$0xff]  }
  0x5a   :  { %v2079_v45 = vld [vmem:[#allocation4 + $0xc4] ss:$8 sps:$4 sm:$0xff]   ;;  %v2081_v47 = vld [vmem:[#allocation4 + $0xc0] ss:$8 sps:$4 sm:$0xff]   ;;  %v2082_v49 = vld [vmem:[#allocation4 + $0xd4] ss:$8 sps:$4 sm:$0xff]  }
  0x5b   :  { %v2098_v50 = vld [vmem:[#allocation9 + $0x38] sm:$0xff]   ;;  %v2085_v52 = vld [vmem:[#allocation4 + $0xe4] ss:$8 sps:$4 sm:$0xff]   ;;  %v2087_v53 = vld [vmem:[#allocation4 + $0xe0] ss:$8 sps:$4 sm:$0xff]  }
  0x5c   :  { %1771 = vmatpush3.bf16.msra.mxu0 %v2036_v9  ;;  %1927 = vmatpush3.bf16.msra.mxu1 %v2093_v23  ;;  %v2084_v51 = vld [vmem:[#allocation4 + $0xd0] ss:$8 sps:$4 sm:$0xff]   ;;  %v2088_v54 = vld [vmem:[#allocation4 + $0xf4] ss:$8 sps:$4 sm:$0xff]   ;;  %v2099_v62 = vld [vmem:[#allocation10] sm:$0xff]  }
  0x5d   :  { %1772 = vmatprep.subr.bf16.mxu0 %v2037_v10  ;;  %1928 = vmatprep.subr.bf16.mxu1 %v2094_v25  ;;  %v2090_v55 = vld [vmem:[#allocation4 + $0xf0] ss:$8 sps:$4 sm:$0xff]  }
  0x60   :  { %1773 = vmatpush3.bf16.msra.mxu0 %v2038_v12  ;;  %1929 = vmatpush3.bf16.msra.mxu1 %v2094_v25 }
  0x61   :  { %1774 = vmatprep.subr.bf16.mxu0 %v2039_v13  ;;  %1930 = vmatprep.subr.bf16.mxu1 %v2095_v44 }
  0x64   :  { %1775 = vmatpush3.bf16.msra.mxu0 %v2040_v14  ;;  %1931 = vmatpush3.bf16.msra.mxu1 %v2095_v44  ;;  %v2104_v44 = vld [vmem:[#allocation10 + $0x28] sm:$0xff]  }
  0x65   :  { %1776 = vmatprep.subr.bf16.mxu0 %v2041_v15  ;;  %1932 = vmatprep.subr.bf16.mxu1 %v2096_v46 }
  0x68   :  { %1777 = vmatpush3.bf16.msra.mxu0 %v2042_v16  ;;  %1933 = vmatpush3.bf16.msra.mxu1 %v2096_v46 }
  0x69   :  { %1934 = vmatprep.subr.bf16.mxu1 %v2097_v48 }
  0x6b   :  { %505 = vmatmul.mubr.bf16.vlgmr.msra.gmra.mrb[0].mxu0 %v2043_v17 }
  0x6c   :  { %512 = vmatprep.mubr.bf16.mxu0 %v2046_v18  ;;  %1935 = vmatpush3.bf16.msra.mxu1 %v2097_v48  ;;  %v2100_v18 = vld [vmem:[#allocation10 + $0x8] sm:$0xff]  }
  0x6d   :  { %1936 = vmatprep.subr.bf16.mxu1 %v2098_v50 }
  0x70   :  { %1937 = vmatpush3.bf16.msra.mxu1 %v2098_v50 }
  0x71   :  { %1970 = vmatprep.subr.bf16.mxu1 %v2099_v62 }
  0x73   :  { %513 = vmatmul.mubr.bf16.gmra.mrb[4].mxu0 %v2048_v19 }
  0x74   :  { %520 = vmatprep.mubr.bf16.mxu0 %v2049_v20 }
  0x7b   :  { %521 = vmatmul.mubr.bf16.gmra.mrb[8].mxu0 %v2051_v24  ;;  %v2101_v24 = vld [vmem:[#allocation10 + $0x10] sm:$0xff]  }
  0x7c   :  { %528 = vmatprep.mubr.bf16.mxu0 %v2052_v26 }
  0x83   :  { %529 = vmatmul.mubr.bf16.gmra.mrb[12].mxu0 %v2054_v27 }
  0x84   :  { %536 = vmatprep.mubr.bf16.mxu0 %v2055_v28 }
  0x8b   :  { %537 = vmatmul.mubr.bf16.gmra.mrb[16].mxu0 %v2057_v29 }
  0x8c   :  { %544 = vmatprep.mubr.bf16.mxu0 %v2058_v30 }
  0x93   :  { %545 = vmatmul.mubr.bf16.gmra.mrb[20].mxu0 %v2060_v31  ;;  %v2102_v31 = vld [vmem:[#allocation10 + $0x18] sm:$0xff]  }
  0x94   :  { %552 = vmatprep.mubr.bf16.mxu0 %v2061_v32 }
  0x9b   :  { %553 = vmatmul.mubr.bf16.gmra.mrb[24].mxu0 %v2063_v33 }
  0x9c   :  { %560 = vmatprep.mubr.bf16.mxu0 %v2064_v34 }
  0xa3   :  { %561 = vmatmul.mubr.bf16.gmra.mrb[28].mxu0 %v2066_v35 }
  0xa4   :  { %568 = vmatprep.mubr.bf16.mxu0 %v2067_v36 }
  0xab   :  { %569 = vmatmul.mubr.bf16.gmra.mrb[32].mxu0 %v2069_v37  ;;  %v2103_v37 = vld [vmem:[#allocation10 + $0x20] sm:$0xff]  }
  0xac   :  { %576 = vmatprep.mubr.bf16.mxu0 %v2070_v38 }
  0xb3   :  { %577 = vmatmul.mubr.bf16.gmra.mrb[36].mxu0 %v2072_v39 }
  0xb4   :  { %584 = vmatprep.mubr.bf16.mxu0 %v2073_v40 }
  0xbb   :  { %585 = vmatmul.mubr.bf16.gmra.mrb[40].mxu0 %v2075_v41 }
  0xbc   :  { %592 = vmatprep.mubr.bf16.mxu0 %v2076_v42 }
  0xc3   :  { %593 = vmatmul.mubr.bf16.gmra.mrb[44].mxu0 %v2078_v43 }
  0xc4   :  { %600 = vmatprep.mubr.bf16.mxu0 %v2079_v45 }
  0xcb   :  { %601 = vmatmul.mubr.bf16.gmra.mrb[48].mxu0 %v2081_v47 }
  0xcc   :  { %608 = vmatprep.mubr.bf16.mxu0 %v2082_v49 }
  0xd3   :  { %609 = vmatmul.mubr.bf16.gmra.mrb[52].mxu0 %v2084_v51 }
  0xd4   :  { %616 = vmatprep.mubr.bf16.mxu0 %v2085_v52 }
  0xdb   :  { %617 = vmatmul.mubr.bf16.gmra.mrb[56].mxu0 %v2087_v53 }
  0xdc   :  { %624 = vmatprep.mubr.bf16.mxu0 %v2088_v54 }
  0xe3   :  { %625 = vmatmul.mubr.bf16.gmra.mrb[60].mxu0 %v2090_v55 }
 0x13e   :  { %v1778_v56 = vpop.f32.mrb[0].mxu0 }
 0x13f   :  { %v1779_v57 = vpop.f32.mrb[1].mxu0 }
 0x140   :  { %v1780_v59 = vadd.f32 %v1779_v57, %v1778_v56  ;;  %v1781_v60 = vpop.f32.mrb[2].mxu0 }
 0x141   :  { %v1782_v61 = vpop.f32.mrb[3].mxu0 }
 0x142   :  { %v766_v63 = vmul.f32 %v1780_v59, %v2341_v58  ;;  %v1783_v0 = vadd.f32 %v1782_v61, %v1781_v60  ;;  %vm733_vm0 = vcmp.gt.f32.partialorder %v1780_v59, 0.0 }
 0x144   :  { %v767_v1 = vmul.f32 %v1783_v0, %v2341_v58  ;;  %vm734_vm1 = vcmp.gt.f32.partialorder %v1783_v0, 0.0  ;;  %v798_v3 = vsel %vm733_vm0, %v1780_v59, %v766_v63 }
 0x146   :  { %v1784_v2 = vpop.f32.mrb[4].mxu0  ;;  %v799_v4 = vsel %vm734_vm1, %v1783_v0, %v767_v1 }
 0x147   :  { %v1785_v5 = vpop.f32.mrb[5].mxu0  ;;  %v830_v6 = vpack.c.bf16 %v799_v4, %v798_v3 }
 0x148   :  { %v1786_v7 = vadd.f32 %v1785_v5, %v1784_v2  ;;  %v1787_v8 = vpop.f32.mrb[6].mxu0 }
 0x149   :  { %v1788_v9 = vpop.f32.mrb[7].mxu0  ;;  %1938 = vmatprep.mubr.bf16.mxu1 %v830_v6 }
 0x14a   :  { %v768_v10 = vmul.f32 %v1786_v7, %v2341_v58  ;;  %v1789_v11 = vadd.f32 %v1788_v9, %v1787_v8  ;;  %vm735_vm2 = vcmp.gt.f32.partialorder %v1786_v7, 0.0 }
 0x14c   :  { %vm736_vm3 = vcmp.gt.f32.partialorder %v1789_v11, 0.0  ;;  %v769_v12 = vmul.f32 %v1789_v11, %v2341_v58  ;;  %v800_v14 = vsel %vm735_vm2, %v1786_v7, %v768_v10 }
 0x14e   :  { %v1790_v13 = vpop.f32.mrb[8].mxu0  ;;  %v801_v15 = vsel %vm736_vm3, %v1789_v11, %v769_v12 }
 0x14f   :  { %v1791_v16 = vpop.f32.mrb[9].mxu0  ;;  %v831_v17 = vpack.c.bf16 %v801_v15, %v800_v14 }
 0x150   :  { %v1792_v19 = vadd.f32 %v1791_v16, %v1790_v13  ;;  %v1793_v20 = vpop.f32.mrb[10].mxu0 }
 0x151   :  { %v1794_v21 = vpop.f32.mrb[11].mxu0  ;;  %1939 = vmatmul.mubr.bf16.vlgmr.msra.gmra.mrb[0].mxu1 %v831_v17 }
 0x152   :  { %v770_v22 = vmul.f32 %v1792_v19, %v2341_v58  ;;  %v1795_v23 = vadd.f32 %v1794_v21, %v1793_v20  ;;  %1971 = vmatpush3.bf16.msra.mxu1 %v2099_v62  ;;  %vm737_vm4 = vcmp.gt.f32.partialorder %v1792_v19, 0.0 }
 0x153   :  { %1972 = vmatprep.subr.bf16.mxu1 %v2100_v18 }
 0x154   :  { %vm738_vm5 = vcmp.gt.f32.partialorder %v1795_v23, 0.0  ;;  %v771_v25 = vmul.f32 %v1795_v23, %v2341_v58  ;;  %v802_v27 = vsel %vm737_vm4, %v1792_v19, %v770_v22 }
 0x156   :  { %v1796_v26 = vpop.f32.mrb[12].mxu0  ;;  %v803_v28 = vsel %vm738_vm5, %v1795_v23, %v771_v25  ;;  %1973 = vmatpush3.bf16.msra.mxu1 %v2100_v18 }
 0x157   :  { %v1797_v29 = vpop.f32.mrb[13].mxu0  ;;  %v832_v30 = vpack.c.bf16 %v803_v28, %v802_v27  ;;  %1974 = vmatprep.subr.bf16.mxu1 %v2101_v24 }
 0x158   :  { %v1798_v32 = vadd.f32 %v1797_v29, %v1796_v26  ;;  %v1799_v33 = vpop.f32.mrb[14].mxu0 }
 0x159   :  { %v1800_v34 = vpop.f32.mrb[15].mxu0  ;;  %1942 = vmatprep.mubr.bf16.mxu1 %v832_v30 }
 0x15a   :  { %v772_v35 = vmul.f32 %v1798_v32, %v2341_v58  ;;  %v1801_v36 = vadd.f32 %v1800_v34, %v1799_v33  ;;  %1975 = vmatpush3.bf16.msra.mxu1 %v2101_v24  ;;  %vm739_vm6 = vcmp.gt.f32.partialorder %v1798_v32, 0.0 }
 0x15b   :  { %1976 = vmatprep.subr.bf16.mxu1 %v2102_v31 }
 0x15c   :  { %vm740_vm7 = vcmp.gt.f32.partialorder %v1801_v36, 0.0  ;;  %v773_v38 = vmul.f32 %v1801_v36, %v2341_v58  ;;  %v804_v40 = vsel %vm739_vm6, %v1798_v32, %v772_v35 }
 0x15e   :  { %v1802_v39 = vpop.f32.mrb[16].mxu0  ;;  %v805_v41 = vsel %vm740_vm7, %v1801_v36, %v773_v38  ;;  %1977 = vmatpush3.bf16.msra.mxu1 %v2102_v31 }
 0x15f   :  { %v1803_v42 = vpop.f32.mrb[17].mxu0  ;;  %v833_v43 = vpack.c.bf16 %v805_v41, %v804_v40  ;;  %1978 = vmatprep.subr.bf16.mxu1 %v2103_v37 }
 0x160   :  { %v1804_v45 = vadd.f32 %v1803_v42, %v1802_v39  ;;  %v1805_v46 = vpop.f32.mrb[18].mxu0 }
 0x161   :  { %v1806_v47 = vpop.f32.mrb[19].mxu0  ;;  %1943 = vmatmul.mubr.bf16.gmra.mrb[4].mxu1 %v833_v43 }
 0x162   :  { %v774_v48 = vmul.f32 %v1804_v45, %v2341_v58  ;;  %v1807_v49 = vadd.f32 %v1806_v47, %v1805_v46  ;;  %1979 = vmatpush3.bf16.msra.mxu1 %v2103_v37  ;;  %vm741_vm8 = vcmp.gt.f32.partialorder %v1804_v45, 0.0 }
 0x163   :  { %1980 = vmatprep.subr.bf16.mxu1 %v2104_v44 }
 0x164   :  { %vm742_vm9 = vcmp.gt.f32.partialorder %v1807_v49, 0.0  ;;  %v775_v50 = vmul.f32 %v1807_v49, %v2341_v58  ;;  %v806_v52 = vsel %vm741_vm8, %v1804_v45, %v774_v48 }
 0x166   :  { %v1808_v51 = vpop.f32.mrb[20].mxu0  ;;  %v807_v53 = vsel %vm742_vm9, %v1807_v49, %v775_v50  ;;  %1981 = vmatpush3.bf16.msra.mxu1 %v2104_v44 }
 0x167   :  { %v1809_v54 = vpop.f32.mrb[21].mxu0  ;;  %v834_v55 = vpack.c.bf16 %v807_v53, %v806_v52 }
 0x168   :  { %v1810_v56 = vadd.f32 %v1809_v54, %v1808_v51  ;;  %v1811_v57 = vpop.f32.mrb[22].mxu0 }
 0x169   :  { %v1812_v59 = vpop.f32.mrb[23].mxu0  ;;  %1946 = vmatprep.mubr.bf16.mxu1 %v834_v55 }
 0x16a   :  { %v776_v60 = vmul.f32 %v1810_v56, %v2341_v58  ;;  %v1813_v61 = vadd.f32 %v1812_v59, %v1811_v57  ;;  %vm743_vm10 = vcmp.gt.f32.partialorder %v1810_v56, 0.0 }
 0x16c   :  { %vm744_vm11 = vcmp.gt.f32.partialorder %v1813_v61, 0.0  ;;  %v777_v62 = vmul.f32 %v1813_v61, %v2341_v58  ;;  %v808_v0 = vsel %vm743_vm10, %v1810_v56, %v776_v60 }
 0x16e   :  { %v1814_v63 = vpop.f32.mrb[24].mxu0  ;;  %v809_v1 = vsel %vm744_vm11, %v1813_v61, %v777_v62 }
 0x16f   :  { %v1815_v2 = vpop.f32.mrb[25].mxu0  ;;  %v835_v3 = vpack.c.bf16 %v809_v1, %v808_v0 }
 0x170   :  { %v1816_v4 = vadd.f32 %v1815_v2, %v1814_v63  ;;  %v1817_v5 = vpop.f32.mrb[26].mxu0 }
 0x171   :  { %v1818_v6 = vpop.f32.mrb[27].mxu0  ;;  %1947 = vmatmul.mubr.bf16.gmra.mrb[8].mxu1 %v835_v3 }
 0x172   :  { %v778_v7 = vmul.f32 %v1816_v4, %v2341_v58  ;;  %v1819_v8 = vadd.f32 %v1818_v6, %v1817_v5  ;;  %vm745_vm12 = vcmp.gt.f32.partialorder %v1816_v4, 0.0 }
 0x174   :  { %vm746_vm13 = vcmp.gt.f32.partialorder %v1819_v8, 0.0  ;;  %v779_v9 = vmul.f32 %v1819_v8, %v2341_v58  ;;  %v810_v11 = vsel %vm745_vm12, %v1816_v4, %v778_v7 }
 0x176   :  { %v1820_v10 = vpop.f32.mrb[28].mxu0  ;;  %v811_v12 = vsel %vm746_vm13, %v1819_v8, %v779_v9 }
 0x177   :  { %v1821_v13 = vpop.f32.mrb[29].mxu0  ;;  %v836_v14 = vpack.c.bf16 %v811_v12, %v810_v11 }
 0x178   :  { %v1822_v15 = vadd.f32 %v1821_v13, %v1820_v10  ;;  %v1823_v16 = vpop.f32.mrb[30].mxu0  ;;  %v2105_v13 = vld [vmem:[#allocation10 + $0x30] sm:$0xff]  }
 0x179   :  { %v1824_v17 = vpop.f32.mrb[31].mxu0  ;;  %1950 = vmatprep.mubr.bf16.mxu1 %v836_v14  ;;  %1982 = vmatprep.subr.bf16.mxu1 %v2105_v13 }
 0x17a   :  { %v780_v18 = vmul.f32 %v1822_v15, %v2341_v58  ;;  %v1825_v19 = vadd.f32 %v1824_v17, %v1823_v16  ;;  %vm747_vm14 = vcmp.gt.f32.partialorder %v1822_v15, 0.0  ;;  %1983 = vmatpush3.bf16.msra.mxu1 %v2105_v13 }
 0x17c   :  { %vm748_vm15 = vcmp.gt.f32.partialorder %v1825_v19, 0.0  ;;  %v781_v20 = vmul.f32 %v1825_v19, %v2341_v58  ;;  %v812_v22 = vsel %vm747_vm14, %v1822_v15, %v780_v18 }
 0x17e   :  { %v1826_v21 = vpop.f32.mrb[32].mxu0  ;;  %v813_v23 = vsel %vm748_vm15, %v1825_v19, %v781_v20 }
 0x17f   :  { %v1827_v24 = vpop.f32.mrb[33].mxu0  ;;  %v837_v25 = vpack.c.bf16 %v813_v23, %v812_v22  ;;  %v2106_v22 = vld [vmem:[#allocation10 + $0x38] sm:$0xff]  }
 0x180   :  { %v1828_v26 = vadd.f32 %v1827_v24, %v1826_v21  ;;  %v1829_v27 = vpop.f32.mrb[34].mxu0  ;;  %1984 = vmatprep.subr.bf16.mxu1 %v2106_v22 }
 0x181   :  { %v1830_v28 = vpop.f32.mrb[35].mxu0  ;;  %1951 = vmatmul.mubr.bf16.gmra.mrb[12].mxu1 %v837_v25 }
 0x182   :  { %v782_v29 = vmul.f32 %v1828_v26, %v2341_v58  ;;  %v1831_v30 = vadd.f32 %v1830_v28, %v1829_v27  ;;  %vm749_vm0 = vcmp.gt.f32.partialorder %v1828_v26, 0.0  ;;  %1985 = vmatpush3.bf16.msra.mxu1 %v2106_v22 }
 0x184   :  { %vm750_vm1 = vcmp.gt.f32.partialorder %v1831_v30, 0.0  ;;  %v783_v31 = vmul.f32 %v1831_v30, %v2341_v58  ;;  %v814_v33 = vsel %vm749_vm0, %v1828_v26, %v782_v29 }
 0x186   :  { %v1832_v32 = vpop.f32.mrb[36].mxu0  ;;  %v815_v34 = vsel %vm750_vm1, %v1831_v30, %v783_v31 }
 0x187   :  { %v1833_v35 = vpop.f32.mrb[37].mxu0  ;;  %v838_v36 = vpack.c.bf16 %v815_v34, %v814_v33 }
 0x188   :  { %v1834_v37 = vadd.f32 %v1833_v35, %v1832_v32  ;;  %v1835_v38 = vpop.f32.mrb[38].mxu0 }
 0x189   :  { %v1836_v39 = vpop.f32.mrb[39].mxu0  ;;  %1954 = vmatprep.mubr.bf16.mxu1 %v838_v36 }
 0x18a   :  { %v784_v40 = vmul.f32 %v1834_v37, %v2341_v58  ;;  %v1837_v41 = vadd.f32 %v1836_v39, %v1835_v38  ;;  %vm751_vm2 = vcmp.gt.f32.partialorder %v1834_v37, 0.0 }
 0x18c   :  { %vm752_vm3 = vcmp.gt.f32.partialorder %v1837_v41, 0.0  ;;  %v785_v42 = vmul.f32 %v1837_v41, %v2341_v58  ;;  %v816_v44 = vsel %vm751_vm2, %v1834_v37, %v784_v40 }
 0x18e   :  { %v1838_v43 = vpop.f32.mrb[40].mxu0  ;;  %v817_v45 = vsel %vm752_vm3, %v1837_v41, %v785_v42 }
 0x18f   :  { %v1839_v46 = vpop.f32.mrb[41].mxu0  ;;  %v839_v47 = vpack.c.bf16 %v817_v45, %v816_v44 }
 0x190   :  { %v1840_v48 = vadd.f32 %v1839_v46, %v1838_v43  ;;  %v1841_v49 = vpop.f32.mrb[42].mxu0 }
 0x191   :  { %v1842_v50 = vpop.f32.mrb[43].mxu0  ;;  %1955 = vmatmul.mubr.bf16.gmra.mrb[16].mxu1 %v839_v47 }
 0x192   :  { %v786_v51 = vmul.f32 %v1840_v48, %v2341_v58  ;;  %v1843_v52 = vadd.f32 %v1842_v50, %v1841_v49  ;;  %vm753_vm4 = vcmp.gt.f32.partialorder %v1840_v48, 0.0 }
 0x194   :  { %vm754_vm5 = vcmp.gt.f32.partialorder %v1843_v52, 0.0  ;;  %v787_v53 = vmul.f32 %v1843_v52, %v2341_v58  ;;  %v818_v55 = vsel %vm753_vm4, %v1840_v48, %v786_v51  ;;  %v2378_v51 = vld [vmem:[%s2468_s4] ss:$0 sm:$0xff] }
 0x196   :  { %v1844_v54 = vpop.f32.mrb[44].mxu0  ;;  %v819_v56 = vsel %vm754_vm5, %v1843_v52, %v787_v53 }
 0x197   :  { %v1845_v57 = vpop.f32.mrb[45].mxu0  ;;  %v840_v59 = vpack.c.bf16 %v819_v56, %v818_v55 }
 0x198   :  { %v1846_v60 = vadd.f32 %v1845_v57, %v1844_v54  ;;  %v1847_v61 = vpop.f32.mrb[46].mxu0 }
 0x199   :  { %v1848_v62 = vpop.f32.mrb[47].mxu0  ;;  %1958 = vmatprep.mubr.bf16.mxu1 %v840_v59 }
 0x19a   :  { %v788_v63 = vmul.f32 %v1846_v60, %v2341_v58  ;;  %v1849_v0 = vadd.f32 %v1848_v62, %v1847_v61  ;;  %vm755_vm6 = vcmp.gt.f32.partialorder %v1846_v60, 0.0 }
 0x19c   :  { %vm756_vm7 = vcmp.gt.f32.partialorder %v1849_v0, 0.0  ;;  %v789_v1 = vmul.f32 %v1849_v0, %v2341_v58  ;;  %v820_v3 = vsel %vm755_vm6, %v1846_v60, %v788_v63 }
 0x19e   :  { %v1850_v2 = vpop.f32.mrb[48].mxu0  ;;  %v821_v4 = vsel %vm756_vm7, %v1849_v0, %v789_v1 }
 0x19f   :  { %v1851_v5 = vpop.f32.mrb[49].mxu0  ;;  %v841_v6 = vpack.c.bf16 %v821_v4, %v820_v3 }
 0x1a0   :  { %v1852_v7 = vadd.f32 %v1851_v5, %v1850_v2  ;;  %v1853_v8 = vpop.f32.mrb[50].mxu0 }
 0x1a1   :  { %v1854_v9 = vpop.f32.mrb[51].mxu0  ;;  %1959 = vmatmul.mubr.bf16.gmra.mrb[20].mxu1 %v841_v6 }
 0x1a2   :  { %v790_v10 = vmul.f32 %v1852_v7, %v2341_v58  ;;  %v1855_v11 = vadd.f32 %v1854_v9, %v1853_v8  ;;  %vm757_vm8 = vcmp.gt.f32.partialorder %v1852_v7, 0.0 }
 0x1a4   :  { %vm758_vm9 = vcmp.gt.f32.partialorder %v1855_v11, 0.0  ;;  %v791_v12 = vmul.f32 %v1855_v11, %v2341_v58  ;;  %v822_v15 = vsel %vm757_vm8, %v1852_v7, %v790_v10 }
 0x1a6   :  { %v1856_v14 = vpop.f32.mrb[52].mxu0  ;;  %v823_v16 = vsel %vm758_vm9, %v1855_v11, %v791_v12 }
 0x1a7   :  { %v1857_v17 = vpop.f32.mrb[53].mxu0  ;;  %v842_v18 = vpack.c.bf16 %v823_v16, %v822_v15 }
 0x1a8   :  { %v1858_v19 = vadd.f32 %v1857_v17, %v1856_v14  ;;  %v1859_v20 = vpop.f32.mrb[54].mxu0 }
 0x1a9   :  { %v1860_v21 = vpop.f32.mrb[55].mxu0  ;;  %1962 = vmatprep.mubr.bf16.mxu1 %v842_v18 }
 0x1aa   :  { %v792_v23 = vmul.f32 %v1858_v19, %v2341_v58  ;;  %v1861_v24 = vadd.f32 %v1860_v21, %v1859_v20  ;;  %vm759_vm10 = vcmp.gt.f32.partialorder %v1858_v19, 0.0 }
 0x1ac   :  { %vm760_vm11 = vcmp.gt.f32.partialorder %v1861_v24, 0.0  ;;  %v793_v25 = vmul.f32 %v1861_v24, %v2341_v58  ;;  %v824_v27 = vsel %vm759_vm10, %v1858_v19, %v792_v23 }
 0x1ae   :  { %v1862_v26 = vpop.f32.mrb[56].mxu0  ;;  %v825_v28 = vsel %vm760_vm11, %v1861_v24, %v793_v25 }
 0x1af   :  { %v1863_v29 = vpop.f32.mrb[57].mxu0  ;;  %v843_v30 = vpack.c.bf16 %v825_v28, %v824_v27 }
 0x1b0   :  { %v1864_v31 = vadd.f32 %v1863_v29, %v1862_v26  ;;  %v1865_v32 = vpop.f32.mrb[58].mxu0 }
 0x1b1   :  { %v1866_v33 = vpop.f32.mrb[59].mxu0  ;;  %1963 = vmatmul.mubr.bf16.gmra.mrb[24].mxu1 %v843_v30 }
 0x1b2   :  { %v794_v34 = vmul.f32 %v1864_v31, %v2341_v58  ;;  %v1867_v35 = vadd.f32 %v1866_v33, %v1865_v32  ;;  %vm761_vm12 = vcmp.gt.f32.partialorder %v1864_v31, 0.0 }
 0x1b4   :  { %vm762_vm13 = vcmp.gt.f32.partialorder %v1867_v35, 0.0  ;;  %v795_v36 = vmul.f32 %v1867_v35, %v2341_v58  ;;  %v826_v38 = vsel %vm761_vm12, %v1864_v31, %v794_v34 }
 0x1b6   :  { %v1868_v37 = vpop.f32.mrb[60].mxu0  ;;  %v827_v39 = vsel %vm762_vm13, %v1867_v35, %v795_v36 }
 0x1b7   :  { %v1869_v40 = vpop.f32.mrb[61].mxu0  ;;  %v844_v41 = vpack.c.bf16 %v827_v39, %v826_v38 }
 0x1b8   :  { %v1870_v42 = vadd.f32 %v1869_v40, %v1868_v37  ;;  %v1871_v43 = vpop.f32.mrb[62].mxu0 }
 0x1b9   :  { %v1872_v44 = vpop.f32.mrb[63].mxu0  ;;  %1966 = vmatprep.mubr.bf16.mxu1 %v844_v41 }
 0x1ba   :  { %v796_v45 = vmul.f32 %v1870_v42, %v2341_v58  ;;  %v1873_v46 = vadd.f32 %v1872_v44, %v1871_v43  ;;  %vm763_vm14 = vcmp.gt.f32.partialorder %v1870_v42, 0.0 }
 0x1bc   :  { %vm764_vm15 = vcmp.gt.f32.partialorder %v1873_v46, 0.0  ;;  %v797_v47 = vmul.f32 %v1873_v46, %v2341_v58  ;;  %v828_v48 = vsel %vm763_vm14, %v1870_v42, %v796_v45 }
 0x1be   :  { %v829_v49 = vsel %vm764_vm15, %v1873_v46, %v797_v47 }
 0x1bf   :  { %v845_v50 = vpack.c.bf16 %v829_v49, %v828_v48 }
 0x1c1   :  { %1967 = vmatmul.mubr.bf16.gmra.mrb[28].mxu1 %v845_v50 }
 0x224   :  { %v1940_v52 = vpop.f32.mrb[0].mxu1 }
 0x225   :  { %v960_v53 = vadd.f32 %v1940_v52, %v2378_v51  ;;  %v951_v54 = vpop.f32.mrb[1].mxu1 }
 0x226   :  { %v952_v55 = vadd.f32 %v2378_v51, %v951_v54  ;;  %v1941_v56 = vpop.f32.mrb[2].mxu1 }
 0x227   :  { %v963_v57 = vadd.f32 %v1941_v56, %v2378_v51  ;;  %v954_v59 = vpop.f32.mrb[3].mxu1  ;;  %v1080_v60 = vmax.f32 %v960_v53, 0.0 }
 0x228   :  { %v955_v58 = vadd.f32 %v2378_v51, %v954_v59  ;;  %v1078_v62 = vmax.f32 %v952_v55, 0.0 }
 0x229   :  { %v1081_v61 = vmax.f32 %v963_v57, 0.0 }
 0x22a   :  { %v1079_v63 = vmax.f32 %v955_v58, 0.0 }
 0x22b   :  { %v1111_v0 = vpack.c.bf16 %v1081_v61, %v1080_v60 }
 0x22c   :  { %v1110_v1 = vpack.c.bf16 %v1079_v63, %v1078_v62 }
 0x22e   :  { %1986 = vmatprep.mubr.bf16.mxu1 %v1110_v1 }
 0x22f   :  { %1987 = vmatmul.mubr.bf16.vlgmr.msra.gmra.mrb[32].mxu1 %v1111_v0 }
 0x234   :  { %v1944_v2 = vpop.f32.mrb[4].mxu1 }
 0x235   :  { %v976_v3 = vadd.f32 %v1944_v2, %v2378_v51  ;;  %v967_v4 = vpop.f32.mrb[5].mxu1 }
 0x236   :  { %v968_v5 = vadd.f32 %v2378_v51, %v967_v4  ;;  %v1945_v6 = vpop.f32.mrb[6].mxu1 }
 0x237   :  { %v979_v7 = vadd.f32 %v1945_v6, %v2378_v51  ;;  %v970_v8 = vpop.f32.mrb[7].mxu1  ;;  %v1084_v10 = vmax.f32 %v976_v3, 0.0 }
 0x238   :  { %v971_v9 = vadd.f32 %v2378_v51, %v970_v8  ;;  %v1082_v12 = vmax.f32 %v968_v5, 0.0 }
 0x239   :  { %v1085_v11 = vmax.f32 %v979_v7, 0.0 }
 0x23a   :  { %v1083_v13 = vmax.f32 %v971_v9, 0.0 }
 0x23b   :  { %v1113_v14 = vpack.c.bf16 %v1085_v11, %v1084_v10 }
 0x23c   :  { %v1112_v15 = vpack.c.bf16 %v1083_v13, %v1082_v12 }
 0x23e   :  { %1990 = vmatprep.mubr.bf16.mxu1 %v1112_v15 }
 0x23f   :  { %1991 = vmatmul.mubr.bf16.gmra.mrb[36].mxu1 %v1113_v14 }
 0x244   :  { %v1948_v16 = vpop.f32.mrb[8].mxu1 }
 0x245   :  { %v992_v17 = vadd.f32 %v1948_v16, %v2378_v51  ;;  %v983_v18 = vpop.f32.mrb[9].mxu1 }
 0x246   :  { %v984_v19 = vadd.f32 %v2378_v51, %v983_v18  ;;  %v1949_v20 = vpop.f32.mrb[10].mxu1 }
 0x247   :  { %v995_v21 = vadd.f32 %v1949_v20, %v2378_v51  ;;  %v986_v22 = vpop.f32.mrb[11].mxu1  ;;  %v1088_v24 = vmax.f32 %v992_v17, 0.0 }
 0x248   :  { %v987_v23 = vadd.f32 %v2378_v51, %v986_v22  ;;  %v1086_v26 = vmax.f32 %v984_v19, 0.0 }
 0x249   :  { %v1089_v25 = vmax.f32 %v995_v21, 0.0 }
 0x24a   :  { %v1087_v27 = vmax.f32 %v987_v23, 0.0 }
 0x24b   :  { %v1115_v28 = vpack.c.bf16 %v1089_v25, %v1088_v24 }
 0x24c   :  { %v1114_v29 = vpack.c.bf16 %v1087_v27, %v1086_v26 }
 0x24e   :  { %1994 = vmatprep.mubr.bf16.mxu1 %v1114_v29 }
 0x24f   :  { %1995 = vmatmul.mubr.bf16.gmra.mrb[40].mxu1 %v1115_v28 }
 0x254   :  { %v1952_v30 = vpop.f32.mrb[12].mxu1 }
 0x255   :  { %v1008_v31 = vadd.f32 %v1952_v30, %v2378_v51  ;;  %v999_v32 = vpop.f32.mrb[13].mxu1 }
 0x256   :  { %v1000_v33 = vadd.f32 %v2378_v51, %v999_v32  ;;  %v1953_v34 = vpop.f32.mrb[14].mxu1 }
 0x257   :  { %v1011_v35 = vadd.f32 %v1953_v34, %v2378_v51  ;;  %v1002_v36 = vpop.f32.mrb[15].mxu1  ;;  %v1092_v38 = vmax.f32 %v1008_v31, 0.0 }
 0x258   :  { %v1003_v37 = vadd.f32 %v2378_v51, %v1002_v36  ;;  %v1090_v40 = vmax.f32 %v1000_v33, 0.0 }
 0x259   :  { %v1093_v39 = vmax.f32 %v1011_v35, 0.0 }
 0x25a   :  { %v1091_v41 = vmax.f32 %v1003_v37, 0.0 }
 0x25b   :  { %v1117_v42 = vpack.c.bf16 %v1093_v39, %v1092_v38  ;;  %v2415_v38 = vld [vmem:[%s2470_s6] ss:$0 sm:$0xff]  ;;  %s2233_s6 = smov [#allocation12]  }
 0x25c   :  { %v1116_v43 = vpack.c.bf16 %v1091_v41, %v1090_v40  ;;  %s1523_s8 = sshll.u32 %s2233_s6, 4  ;;  %s1524_s8 = int_to_ptr.vmem [resolvable:$true] %s1523_s8 }
 0x25d   :  { %s2195_s9 = scalar_lea.vmem %s1524_s8, 2048  ;;  %p2200_p5 = scmp.lt.s32.totalorder %s1524_s8, %s1524_s8 }
 0x25e   :  { %1998 = vmatprep.mubr.bf16.mxu1 %v1116_v43  ;;  %p2196_p4 = scmp.ne.s32.totalorder %s1524_s8, %s2195_s9  ;;  %p2201_p6 = scmp.lt.s32.totalorder %s2195_s9, %s2195_s9 }
 0x25f   :  { %1999 = vmatmul.mubr.bf16.gmra.mrb[44].mxu1 %v1117_v42 }
 0x260   :  { %p2202_p7 = por %p2201_p6, %p2200_p5 }
 0x262   :  { %p2203_p8 = pnand %p2202_p7, %p2196_p4 }
 0x264   :  { %v1956_v44 = vpop.f32.mrb[16].mxu1 }
 0x265   :  { %v1024_v45 = vadd.f32 %v1956_v44, %v2378_v51  ;;  %v1015_v46 = vpop.f32.mrb[17].mxu1 }
 0x266   :  { %v1016_v47 = vadd.f32 %v2378_v51, %v1015_v46  ;;  %v1957_v48 = vpop.f32.mrb[18].mxu1 }
 0x267   :  { %v1027_v49 = vadd.f32 %v1957_v48, %v2378_v51  ;;  %v1018_v50 = vpop.f32.mrb[19].mxu1  ;;  %v1096_v53 = vmax.f32 %v1024_v45, 0.0 }
 0x268   :  { %v1019_v52 = vadd.f32 %v2378_v51, %v1018_v50  ;;  %v1094_v55 = vmax.f32 %v1016_v47, 0.0 }
 0x269   :  { %v1097_v54 = vmax.f32 %v1027_v49, 0.0 }
 0x26a   :  { %v1095_v56 = vmax.f32 %v1019_v52, 0.0 }
 0x26b   :  { %v1119_v57 = vpack.c.bf16 %v1097_v54, %v1096_v53 }
 0x26c   :  { %v1118_v59 = vpack.c.bf16 %v1095_v56, %v1094_v55 }
 0x26e   :  { %2002 = vmatprep.mubr.bf16.mxu1 %v1118_v59 }
 0x26f   :  { %2003 = vmatmul.mubr.bf16.gmra.mrb[48].mxu1 %v1119_v57 }
 0x274   :  { %v1960_v58 = vpop.f32.mrb[20].mxu1 }
 0x275   :  { %v1040_v60 = vadd.f32 %v1960_v58, %v2378_v51  ;;  %v1031_v61 = vpop.f32.mrb[21].mxu1 }
 0x276   :  { %v1032_v62 = vadd.f32 %v2378_v51, %v1031_v61  ;;  %v1961_v63 = vpop.f32.mrb[22].mxu1 }
 0x277   :  { %v1043_v0 = vadd.f32 %v1961_v63, %v2378_v51  ;;  %v1034_v1 = vpop.f32.mrb[23].mxu1  ;;  %v1100_v3 = vmax.f32 %v1040_v60, 0.0 }
 0x278   :  { %v1035_v2 = vadd.f32 %v2378_v51, %v1034_v1  ;;  %v1098_v5 = vmax.f32 %v1032_v62, 0.0 }
 0x279   :  { %v1101_v4 = vmax.f32 %v1043_v0, 0.0 }
 0x27a   :  { %v1099_v6 = vmax.f32 %v1035_v2, 0.0 }
 0x27b   :  { %v1121_v7 = vpack.c.bf16 %v1101_v4, %v1100_v3 }
 0x27c   :  { %v1120_v8 = vpack.c.bf16 %v1099_v6, %v1098_v5 }
 0x27e   :  { %2006 = vmatprep.mubr.bf16.mxu1 %v1120_v8 }
 0x27f   :  { %2007 = vmatmul.mubr.bf16.gmra.mrb[52].mxu1 %v1121_v7 }
 0x284   :  { %v1964_v9 = vpop.f32.mrb[24].mxu1 }
 0x285   :  { %v1056_v10 = vadd.f32 %v1964_v9, %v2378_v51  ;;  %v1047_v11 = vpop.f32.mrb[25].mxu1 }
 0x286   :  { %v1048_v12 = vadd.f32 %v2378_v51, %v1047_v11  ;;  %v1965_v13 = vpop.f32.mrb[26].mxu1 }
 0x287   :  { %v1059_v14 = vadd.f32 %v1965_v13, %v2378_v51  ;;  %v1050_v15 = vpop.f32.mrb[27].mxu1  ;;  %v1104_v17 = vmax.f32 %v1056_v10, 0.0 }
 0x288   :  { %v1051_v16 = vadd.f32 %v2378_v51, %v1050_v15  ;;  %v1102_v19 = vmax.f32 %v1048_v12, 0.0 }
 0x289   :  { %v1105_v18 = vmax.f32 %v1059_v14, 0.0 }
 0x28a   :  { %v1103_v20 = vmax.f32 %v1051_v16, 0.0 }
 0x28b   :  { %v1123_v21 = vpack.c.bf16 %v1105_v18, %v1104_v17 }
 0x28c   :  { %v1122_v22 = vpack.c.bf16 %v1103_v20, %v1102_v19 }
 0x28e   :  { %2010 = vmatprep.mubr.bf16.mxu1 %v1122_v22 }
 0x28f   :  { %2011 = vmatmul.mubr.bf16.gmra.mrb[56].mxu1 %v1123_v21 }
 0x294   :  { %v1968_v23 = vpop.f32.mrb[28].mxu1 }
 0x295   :  { %v1072_v24 = vadd.f32 %v1968_v23, %v2378_v51  ;;  %v1063_v25 = vpop.f32.mrb[29].mxu1 }
 0x296   :  { %v1064_v26 = vadd.f32 %v2378_v51, %v1063_v25  ;;  %v1969_v27 = vpop.f32.mrb[30].mxu1 }
 0x297   :  { %v1075_v28 = vadd.f32 %v1969_v27, %v2378_v51  ;;  %v1066_v29 = vpop.f32.mrb[31].mxu1  ;;  %v1108_v31 = vmax.f32 %v1072_v24, 0.0 }
 0x298   :  { %v1067_v30 = vadd.f32 %v2378_v51, %v1066_v29  ;;  %v1106_v33 = vmax.f32 %v1064_v26, 0.0 }
 0x299   :  { %v1109_v32 = vmax.f32 %v1075_v28, 0.0 }
 0x29a   :  { %v1107_v34 = vmax.f32 %v1067_v30, 0.0 }
 0x29b   :  { %v1125_v35 = vpack.c.bf16 %v1109_v32, %v1108_v31 }
 0x29c   :  { %v1124_v36 = vpack.c.bf16 %v1107_v34, %v1106_v33 }
 0x29e   :  { %2014 = vmatprep.mubr.bf16.mxu1 %v1124_v36 }
 0x29f   :  { %2015 = vmatmul.mubr.bf16.gmra.mrb[60].mxu1 %v1125_v35 }
 0x302   :  { %v1988_v37 = vpop.f32.mrb[32].mxu1 }
 0x303   :  { %v1231_v39 = vpop.f32.mrb[33].mxu1  ;;  %v1240_v41 = vadd.f32 %v1988_v37, %v2415_v38 }
 0x304   :  { %v1989_v40 = vpop.f32.mrb[34].mxu1  ;;  %v1232_v43 = vadd.f32 %v2415_v38, %v1231_v39 }
 0x305   :  { %v1243_v51 = vadd.f32 %v1989_v40, %v2415_v38  ;;  %v1234_v42 = vpop.f32.mrb[35].mxu1 }
 0x306   :  { %v1235_v44 = vadd.f32 %v2415_v38, %v1234_v42 }
 0x307   :  { %v1675_v45 = vpack.c.bf16 %v1243_v51, %v1240_v41 }
 0x308   :  { %v1670_v46 = vpack.c.bf16 %v1235_v44, %v1232_v43 }
 0x309   :  { %1747 = vst [vmem:[#allocation12 + $0x8] sm:$0xff] %v1675_v45  }
 0x30a   :  { %1671 = vst [vmem:[#allocation12] sm:$0xff] %v1670_v46  }
 0x312   :  { %v1992_v47 = vpop.f32.mrb[36].mxu1 }
 0x313   :  { %v1247_v48 = vpop.f32.mrb[37].mxu1  ;;  %v1256_v50 = vadd.f32 %v1992_v47, %v2415_v38 }
 0x314   :  { %v1993_v49 = vpop.f32.mrb[38].mxu1  ;;  %v1248_v54 = vadd.f32 %v2415_v38, %v1247_v48 }
 0x315   :  { %v1259_v52 = vadd.f32 %v1993_v49, %v2415_v38  ;;  %v1250_v53 = vpop.f32.mrb[39].mxu1 }
 0x316   :  { %v1251_v55 = vadd.f32 %v2415_v38, %v1250_v53 }
 0x317   :  { %v1685_v56 = vpack.c.bf16 %v1259_v52, %v1256_v50 }
 0x318   :  { %v1680_v57 = vpack.c.bf16 %v1251_v55, %v1248_v54 }
 0x319   :  { %1749 = vst [vmem:[#allocation12 + $0x18] sm:$0xff] %v1685_v56  }
 0x31a   :  { %1748 = vst [vmem:[#allocation12 + $0x10] sm:$0xff] %v1680_v57  }
 0x322   :  { %v1996_v59 = vpop.f32.mrb[40].mxu1 }
 0x323   :  { %v1263_v58 = vpop.f32.mrb[41].mxu1  ;;  %v1272_v61 = vadd.f32 %v1996_v59, %v2415_v38 }
 0x324   :  { %v1997_v60 = vpop.f32.mrb[42].mxu1  ;;  %v1264_v0 = vadd.f32 %v2415_v38, %v1263_v58 }
 0x325   :  { %v1275_v62 = vadd.f32 %v1997_v60, %v2415_v38  ;;  %v1266_v63 = vpop.f32.mrb[43].mxu1 }
 0x326   :  { %v1267_v1 = vadd.f32 %v2415_v38, %v1266_v63 }
 0x327   :  { %v1695_v2 = vpack.c.bf16 %v1275_v62, %v1272_v61 }
 0x328   :  { %v1690_v3 = vpack.c.bf16 %v1267_v1, %v1264_v0 }
 0x329   :  { %1751 = vst [vmem:[#allocation12 + $0x28] sm:$0xff] %v1695_v2  }
 0x32a   :  { %1750 = vst [vmem:[#allocation12 + $0x20] sm:$0xff] %v1690_v3  }
 0x332   :  { %v2000_v4 = vpop.f32.mrb[44].mxu1 }
 0x333   :  { %v1279_v5 = vpop.f32.mrb[45].mxu1  ;;  %v1288_v7 = vadd.f32 %v2000_v4, %v2415_v38 }
 0x334   :  { %v2001_v6 = vpop.f32.mrb[46].mxu1  ;;  %v1280_v10 = vadd.f32 %v2415_v38, %v1279_v5 }
 0x335   :  { %v1291_v8 = vadd.f32 %v2001_v6, %v2415_v38  ;;  %v1282_v9 = vpop.f32.mrb[47].mxu1 }
 0x336   :  { %v1283_v11 = vadd.f32 %v2415_v38, %v1282_v9 }
 0x337   :  { %v1705_v12 = vpack.c.bf16 %v1291_v8, %v1288_v7 }
 0x338   :  { %v1700_v13 = vpack.c.bf16 %v1283_v11, %v1280_v10 }
 0x339   :  { %1753 = vst [vmem:[#allocation12 + $0x38] sm:$0xff] %v1705_v12  }
 0x33a   :  { %1752 = vst [vmem:[#allocation12 + $0x30] sm:$0xff] %v1700_v13  }
 0x342   :  { %v2004_v14 = vpop.f32.mrb[48].mxu1 }
 0x343   :  { %v1295_v15 = vpop.f32.mrb[49].mxu1  ;;  %v1304_v17 = vadd.f32 %v2004_v14, %v2415_v38 }
 0x344   :  { %v2005_v16 = vpop.f32.mrb[50].mxu1  ;;  %v1296_v20 = vadd.f32 %v2415_v38, %v1295_v15 }
 0x345   :  { %v1307_v18 = vadd.f32 %v2005_v16, %v2415_v38  ;;  %v1298_v19 = vpop.f32.mrb[51].mxu1 }
 0x346   :  { %v1299_v21 = vadd.f32 %v2415_v38, %v1298_v19 }
 0x347   :  { %v1715_v22 = vpack.c.bf16 %v1307_v18, %v1304_v17 }
 0x348   :  { %v1710_v23 = vpack.c.bf16 %v1299_v21, %v1296_v20 }
 0x349   :  { %1755 = vst [vmem:[#allocation12 + $0x48] sm:$0xff] %v1715_v22  }
 0x34a   :  { %1754 = vst [vmem:[#allocation12 + $0x40] sm:$0xff] %v1710_v23  }
 0x352   :  { %v2008_v24 = vpop.f32.mrb[52].mxu1 }
 0x353   :  { %v1311_v25 = vpop.f32.mrb[53].mxu1  ;;  %v1320_v27 = vadd.f32 %v2008_v24, %v2415_v38 }
 0x354   :  { %v2009_v26 = vpop.f32.mrb[54].mxu1  ;;  %v1312_v30 = vadd.f32 %v2415_v38, %v1311_v25 }
 0x355   :  { %v1323_v28 = vadd.f32 %v2009_v26, %v2415_v38  ;;  %v1314_v29 = vpop.f32.mrb[55].mxu1 }
 0x356   :  { %v1315_v31 = vadd.f32 %v2415_v38, %v1314_v29 }
 0x357   :  { %v1725_v32 = vpack.c.bf16 %v1323_v28, %v1320_v27 }
 0x358   :  { %v1720_v33 = vpack.c.bf16 %v1315_v31, %v1312_v30 }
 0x359   :  { %1757 = vst [vmem:[#allocation12 + $0x58] sm:$0xff] %v1725_v32  }
 0x35a   :  { %1756 = vst [vmem:[#allocation12 + $0x50] sm:$0xff] %v1720_v33  }
 0x362   :  { %v2012_v34 = vpop.f32.mrb[56].mxu1 }
 0x363   :  { %v1327_v35 = vpop.f32.mrb[57].mxu1  ;;  %v1336_v37 = vadd.f32 %v2012_v34, %v2415_v38 }
 0x364   :  { %v2013_v36 = vpop.f32.mrb[58].mxu1  ;;  %v1328_v41 = vadd.f32 %v2415_v38, %v1327_v35 }
 0x365   :  { %v1339_v39 = vadd.f32 %v2013_v36, %v2415_v38  ;;  %v1330_v40 = vpop.f32.mrb[59].mxu1 }
 0x366   :  { %v1331_v51 = vadd.f32 %v2415_v38, %v1330_v40 }
 0x367   :  { %v1735_v42 = vpack.c.bf16 %v1339_v39, %v1336_v37 }
 0x368   :  { %v1730_v43 = vpack.c.bf16 %v1331_v51, %v1328_v41 }
 0x369   :  { %1759 = vst [vmem:[#allocation12 + $0x68] sm:$0xff] %v1735_v42  }
 0x36a   :  { %1758 = vst [vmem:[#allocation12 + $0x60] sm:$0xff] %v1730_v43  }
 0x372   :  { %v2016_v44 = vpop.f32.mrb[60].mxu1 }
 0x373   :  { %v1343_v45 = vpop.f32.mrb[61].mxu1  ;;  %v1352_v47 = vadd.f32 %v2016_v44, %v2415_v38 }
 0x374   :  { %v2017_v46 = vpop.f32.mrb[62].mxu1  ;;  %v1344_v50 = vadd.f32 %v2415_v38, %v1343_v45 }
 0x375   :  { %v1355_v48 = vadd.f32 %v2017_v46, %v2415_v38  ;;  %v1346_v49 = vpop.f32.mrb[63].mxu1 }
 0x376   :  { %v1347_v52 = vadd.f32 %v2415_v38, %v1346_v49 }
 0x377   :  { %v1745_v53 = vpack.c.bf16 %v1355_v48, %v1352_v47 }
 0x378   :  { %v1740_v54 = vpack.c.bf16 %v1347_v52, %v1344_v50 }
 0x379   :  { %1761 = vst [vmem:[#allocation12 + $0x78] sm:$0xff] %v1745_v53  }
 0x37a   :  { %1760 = vst [vmem:[#allocation12 + $0x70] sm:$0xff] %v1740_v54  }
 0x37b   :  { %2206 = shalt.err (!%p2203_p8)
}
 0x37c   :  { %s2207_s14 = scalar_lea.hbm %s2471_s7, 2048 }
 0x37d   :  { %p2208_p9 = scmp.ne.s32.totalorder %s2471_s7, %s2207_s14  ;;  %p2211_p10 = scmp.lt.u32.totalorder %s2207_s14, %s2471_s7 }
 0x37f   :  { %p2213_p11 = pnand %p2211_p10, %p2208_p9 }
 0x381   :  { %2216 = shalt.err (!%p2213_p11)
}
 0x382   :  { %1529 = dma.vmem_to_hbm [thread:$0]  %s1524_s8, 2048, %s2471_s7, [#allocation6], %s2226_s11, %s2226_s11, %s2227_s12  }
 0x383   :  { %2223 = dma.done.wait [#allocation6], 2048  }
 0x384   :  { %2224 = vsyncadd [#allocation6], 4294965248 }
 0x385   :  { %1533 = vsyncpa [#allocation5], 1 }
 0x386   :  { %1534 = vsyncpa [#allocation8], 1 }
 0x387   :  { %1535 = vsyncpa [#allocation11], 1 }
 0x388   :  { %1536 = vsyncpa [#allocation6], 1 }

</bundles_post_ra>
